<compile_context>
chip_gen: v6e
topology: v6e:2x2x1
jax: 0.10.0
libtpu: 0.0.40
codegen_flags: <defaults>
</compile_context>

<pallas_src>
import functools

import jax
import jax.numpy as jnp
from jax.experimental import pallas as pl
from jax.experimental.pallas import tpu as pltpu


# ------------- kernel 1: fused meta_net + linear1(mean of layer features) -------------
def _bias_kernel(x_ref, m_ref, w1_ref, b1_ref, w2_ref, b2_ref, wl_ref, bl_ref,
                 top_ref, extra_ref):
    h = jnp.dot(x_ref[...], w1_ref[...], preferred_element_type=jnp.float32) + b1_ref[...]
    h = jnp.maximum(h, 0.0)  # ReLU
    top = jnp.dot(h, w2_ref[...], preferred_element_type=jnp.float32) + b2_ref[...]
    top_ref[...] = top.astype(top_ref.dtype)
    extra = jnp.dot(m_ref[...], wl_ref[...], preferred_element_type=jnp.float32) + bl_ref[...]
    extra_ref[...] = extra.astype(extra_ref.dtype)


def compute_biases(x, mean_feat, w1, b1, w2, b2, wl, bl):
    """top_feature = meta_net(x); bias_extra = linear1(mean_feat) -- one launch."""
    B = x.shape[0]
    ctx_dim = w2.shape[1]
    vmem = pl.BlockSpec(memory_space=pltpu.MemorySpace.VMEM)
    return pl.pallas_call(
        _bias_kernel,
        out_shape=(jax.ShapeDtypeStruct((B, ctx_dim), x.dtype),
                   jax.ShapeDtypeStruct((B, ctx_dim), x.dtype)),
        in_specs=[vmem] * 8,
        out_specs=(vmem, vmem),
    )(x, mean_feat, w1, b1.reshape(1, -1), w2, b2.reshape(1, -1), wl, bl.reshape(1, -1))


# ---------------- kernel 1b: meta_net only (single-feature input path) ----------------
def _meta_kernel(x_ref, w1_ref, b1_ref, w2_ref, b2_ref, o_ref):
    h = jnp.maximum(
        jnp.dot(x_ref[...], w1_ref[...], preferred_element_type=jnp.float32) + b1_ref[...],
        0.0)
    o_ref[...] = (jnp.dot(h, w2_ref[...], preferred_element_type=jnp.float32)
                  + b2_ref[...]).astype(o_ref.dtype)


def meta_net(x, w1, b1, w2, b2):
    B = x.shape[0]
    ctx_dim = w2.shape[1]
    vmem = pl.BlockSpec(memory_space=pltpu.MemorySpace.VMEM)
    return pl.pallas_call(
        _meta_kernel,
        out_shape=jax.ShapeDtypeStruct((B, ctx_dim), x.dtype),
        in_specs=[vmem] * 5,
        out_specs=vmem,
    )(x, w1, b1.reshape(1, -1), w2, b2.reshape(1, -1))


# ------------------- kernel 2: prompt assembly (direct slice stores) -------------------
def _prompt_kernel(n_ctx, ctx_ref, be_ref, bt_ref, prefix_ref, suffix_ref, o_ref):
    half = n_ctx // 2
    tile_cls = o_ref.shape[1]

    be = be_ref[0]  # (1, ctx_dim) bias_extra for this batch element
    bt = bt_ref[0]  # (1, ctx_dim) bias_top  for this batch element

    # Prefix / suffix: one block-wide, lane-dense slice store each.
    o_ref[0, :, 0:1, :] = prefix_ref[...].astype(o_ref.dtype)
    o_ref[0, :, 1 + n_ctx:, :] = suffix_ref[...].astype(o_ref.dtype)

    # ctx + per-half bias computed ONCE ((n_ctx, ctx_dim) -- a handful of vregs),
    # then written per class; no (tile_cls, n_ctx, ctx_dim) broadcast temporaries.
    ctx_hi = (ctx_ref[half:n_ctx, :] + bt).astype(o_ref.dtype)  # (n_ctx-half, ctx_dim)
    if half > 0:
        ctx_lo = (ctx_ref[0:half, :] + be).astype(o_ref.dtype)  # (half, ctx_dim)

    def write_one(i, carry):
        if half > 0:
            o_ref[0, i, 1:1 + half, :] = ctx_lo
        o_ref[0, i, 1 + half:1 + n_ctx, :] = ctx_hi
        return carry

    unroll = True if tile_cls <= 8 else 8
    jax.lax.fori_loop(0, tile_cls, write_one, 0, unroll=unroll)


def _vmem_config():
    """(class-tile VMEM budget, scoped vmem limit) per TPU generation."""
    kind = ""
    try:
        kind = jax.devices()[0].device_kind.lower()
    except Exception:
        pass
    if ("v5" in kind) or ("v6" in kind):
        # 128 MiB physical VMEM: raise the scoped limit and use large tiles.
        return 64 * 1024 * 1024, 96 * 1024 * 1024
    # v7x (64 MiB physical VMEM) or unknown chip: stay conservative.
    return 28 * 1024 * 1024, 40 * 1024 * 1024


def _pick_class_tile(n_cls, n_ctx, seq_len, ctx_dim, itemsize, budget_bytes):
    """Largest class tile whose double-buffered blocks fit the VMEM budget."""
    n_suf = seq_len - 1 - n_ctx
    # Blocks that scale with the class tile (each double-buffered by the pipeline):
    #   output (seq_len rows) + suffix (n_suf rows) + prefix (1 row), ctx_dim lanes each.
    per_cls = (seq_len + n_suf + 1) * ctx_dim * itemsize * 2
    # Resident fixed blocks: ctx (n_ctx rows) + bias_extra + bias_top (1 row each).
    fixed = (n_ctx + 2) * ctx_dim * itemsize * 2
    cap = max(1, (budget_bytes - fixed) // per_cls)
    return int(min(n_cls, cap))


def build_prompts(ctx, bias_extra, bias_top, prefix, suffix):
    B, ctx_dim = bias_top.shape
    n_ctx = ctx.shape[0]
    n_cls = prefix.shape[0]
    n_suf = suffix.shape[1]
    seq_len = 1 + n_ctx + n_suf

    budget, vmem_limit = _vmem_config()
    tile_cls = _pick_class_tile(n_cls, n_ctx, seq_len, ctx_dim, ctx.dtype.itemsize, budget)
    num_c_tiles = pl.cdiv(n_cls, tile_cls)  # partial trailing tile masked by Pallas

    # (B, 1, ctx_dim) so each per-batch block's last two dims equal the array dims
    # (keeps the (8,128) block constraint satisfied for any B).
    be3 = bias_extra[:, None, :]
    bt3 = bias_top[:, None, :]

    kernel = functools.partial(_prompt_kernel, n_ctx)
    return pl.pallas_call(
        kernel,
        out_shape=jax.ShapeDtypeStruct((B, n_cls, seq_len, ctx_dim), ctx.dtype),
        # Class tile is the slow (leading) axis, batch the fast (inner) axis: the
        # prefix/suffix block indices depend only on the class index, so those tiles
        # stay VMEM-resident across all B inner iterations (Pallas skips the re-DMA).
        grid=(num_c_tiles, B),
        in_specs=[
            pl.BlockSpec((n_ctx, ctx_dim), lambda c, b: (0, 0)),              # ctx (resident)
            pl.BlockSpec((1, 1, ctx_dim), lambda c, b: (b, 0, 0)),            # bias_extra[b]
            pl.BlockSpec((1, 1, ctx_dim), lambda c, b: (b, 0, 0)),            # bias_top[b]
            pl.BlockSpec((tile_cls, 1, ctx_dim), lambda c, b: (c, 0, 0)),     # prefix tile
            pl.BlockSpec((tile_cls, n_suf, ctx_dim), lambda c, b: (c, 0, 0)),  # suffix tile
        ],
        out_specs=pl.BlockSpec((1, tile_cls, seq_len, ctx_dim),
                               lambda c, b: (b, c, 0, 0)),
        compiler_params=pltpu.CompilerParams(
            # Megacore shards the class-tile axis (keeps per-core suffix residency);
            # batch axis stays sequential.
            dimension_semantics=("parallel", "arbitrary"),
            vmem_limit_bytes=vmem_limit),
    )(ctx, be3, bt3, prefix, suffix)


# ------------------------------------ forward glue ------------------------------------
def prompt_learner_forward(params, im_features):
    """Mirrors PromptLearner.forward(im_features) -> (prompts, top_feature)."""
    x = im_features[-1]
    if len(im_features) > 1:
        # Sum in the wrapper (XLA fuses the adds; no (11, B, trans) stack in HBM).
        # Divide by 11 unconditionally -- exactly like the PyTorch module (which
        # assumes >= 11 intermediate features are passed).
        mean_feat = sum(im_features[:11]) / 11.0
        top_feature, bias_extra = compute_biases(
            x, mean_feat,
            params["w1"], params["b1"], params["w2"], params["b2"],
            params["wl"], params["bl"])
        bias_top = top_feature
    else:
        top_feature = meta_net(x, params["w1"], params["b1"], params["w2"], params["b2"])
        bias_extra = top_feature  # ctx + bias on all tokens == both halves get top_feature
        bias_top = top_feature
    prompts = build_prompts(
        params["ctx"], bias_extra, bias_top, params["token_prefix"], params["token_suffix"])
    return prompts, top_feature


# --------------------------------- pure-JAX reference ---------------------------------
def reference_forward(params, im_features):
    x = im_features[-1]
    h = jnp.maximum(x @ params["w1"] + params["b1"], 0.0)
    top = h @ params["w2"] + params["b2"]
    bias_extra = (sum(im_features[:11]) / 11.0) @ params["wl"] + params["bl"]
    bias_top = top
    ctx = params["ctx"]
    n_ctx, d = ctx.shape
    B = x.shape[0]
    half = n_ctx // 2
    bias = jnp.concatenate(
        [
            jnp.repeat(bias_extra[:, None, :], half, axis=1),
            jnp.repeat(bias_top[:, None, :], n_ctx - half, axis=1),
        ],
        axis=1,
    )
    ctx_shifted = ctx[None] + bias  # (B, n_ctx, d)
    prefix, suffix = params["token_prefix"], params["token_suffix"]
    n_cls = prefix.shape[0]
    n_suf = suffix.shape[1]
    prompts = jnp.concatenate(
        [
            jnp.broadcast_to(prefix[None], (B, n_cls, 1, d)),
            jnp.broadcast_to(ctx_shifted[:, None], (B, n_cls, n_ctx, d)),
            jnp.broadcast_to(suffix[None], (B, n_cls, n_suf, d)),
        ],
        axis=2,
    )
    return prompts, top


if __name__ == "__main__":
    # Small synthetic shapes consistent with the module's forward.
    # ctx_dim is a multiple of 128 so output stores are lane-dense (CLIP ctx_dim=512 too).
    B = 2          # batch
    vis_dim = 32   # clip_model.visual.output_dim
    ctx_dim = 128  # clip_model.ln_final.weight.shape[0]
    trans_dim = 48 # clip_model.visual.ln_post.normalized_shape[0] (768 in CLIP)
    n_ctx = 4      # context tokens
    n_cls = 4      # number of classes
    seq_len = 16   # tokenized prompt length (77 in CLIP)
    n_suf = seq_len - 1 - n_ctx

    key = jax.random.PRNGKey(0)
    ks = jax.random.split(key, 16)

    params = {
        "ctx": 0.02 * jax.random.normal(ks[0], (n_ctx, ctx_dim), jnp.float32),
        # meta_net: Linear(vis, 2*vis) -> ReLU -> Linear(2*vis, ctx_dim)
        "w1": 0.05 * jax.random.normal(ks[1], (vis_dim, 2 * vis_dim), jnp.float32),
        "b1": 0.05 * jax.random.normal(ks[2], (2 * vis_dim,), jnp.float32),
        "w2": 0.05 * jax.random.normal(ks[3], (2 * vis_dim, ctx_dim), jnp.float32),
        "b2": 0.05 * jax.random.normal(ks[4], (ctx_dim,), jnp.float32),
        # linear1: Linear(trans_dim, ctx_dim)  (768 -> 512 in the real model)
        "wl": 0.05 * jax.random.normal(ks[5], (trans_dim, ctx_dim), jnp.float32),
        "bl": 0.05 * jax.random.normal(ks[6], (ctx_dim,), jnp.float32),
        # frozen token-embedding buffers (built at init time in the PyTorch module)
        "token_prefix": jax.random.normal(ks[7], (n_cls, 1, ctx_dim), jnp.float32),
        "token_suffix": jax.random.normal(ks[8], (n_cls, n_suf, ctx_dim), jnp.float32),
    }

    # im_features: 11 intermediate layer features (B, trans_dim) + final feature (B, vis_dim)
    im_features = [
        jax.random.normal(jax.random.fold_in(ks[9], i), (B, trans_dim), jnp.float32)
        for i in range(11)
    ] + [jax.random.normal(ks[10], (B, vis_dim), jnp.float32)]

    prompts, top_feature = prompt_learner_forward(params, im_features)
    prompts = jax.block_until_ready(prompts)
    top_feature = jax.block_until_ready(top_feature)

    ref_prompts, ref_top = reference_forward(params, im_features)
    assert prompts.shape == (B, n_cls, seq_len, ctx_dim)
    assert top_feature.shape == (B, ctx_dim)
    assert jnp.allclose(prompts, ref_prompts, atol=1e-5, rtol=1e-5)
    assert jnp.allclose(top_feature, ref_top, atol=1e-5, rtol=1e-5)

    print("KERNEL_OK")
</pallas_src>

<mosaic_0001>
module attributes {stable_mosaic.version = 11 : i64} {
  func.func @_bias_kernel(%arg0: memref<2x32xf32, #tpu.memory_space<vmem>>, %arg1: memref<2x48xf32, #tpu.memory_space<vmem>>, %arg2: memref<32x64xf32, #tpu.memory_space<vmem>>, %arg3: memref<1x64xf32, #tpu.memory_space<vmem>>, %arg4: memref<64x128xf32, #tpu.memory_space<vmem>>, %arg5: memref<1x128xf32, #tpu.memory_space<vmem>>, %arg6: memref<48x128xf32, #tpu.memory_space<vmem>>, %arg7: memref<1x128xf32, #tpu.memory_space<vmem>>, %arg8: memref<2x128xf32, #tpu.memory_space<vmem>>, %arg9: memref<2x128xf32, #tpu.memory_space<vmem>>) attributes {dimension_semantics = [], scalar_prefetch = 0 : i64, scratch_operands = 0 : i64, tpu.core_type = #tpu.core_type<tc>} {
    %c0 = arith.constant 0 : index
    %c0_0 = arith.constant 0 : index
    %0 = vector.load %arg0[%c0, %c0_0] : memref<2x32xf32, #tpu.memory_space<vmem>>, vector<2x32xf32>
    %c0_1 = arith.constant 0 : index
    %c0_2 = arith.constant 0 : index
    %1 = vector.load %arg2[%c0_1, %c0_2] : memref<32x64xf32, #tpu.memory_space<vmem>>, vector<32x64xf32>
    %cst = arith.constant dense<0.000000e+00> : vector<2x64xf32>
    %2 = tpu.matmul %0, %1, %cst {dimension_numbers = #tpu.dot_dimension_numbers<[1], [0], [0], [1], [0, 0, 1, 1], [], []>} : vector<2x32xf32>, vector<32x64xf32>, vector<2x64xf32> -> vector<2x64xf32>
    %c0_3 = arith.constant 0 : index
    %c0_4 = arith.constant 0 : index
    %3 = vector.load %arg3[%c0_3, %c0_4] : memref<1x64xf32, #tpu.memory_space<vmem>>, vector<1x64xf32>
    %4 = vector.broadcast %3 : vector<1x64xf32> to vector<2x64xf32>
    %5 = arith.addf %2, %4 : vector<2x64xf32>
    %cst_5 = arith.constant 0.000000e+00 : f32
    %6 = vector.broadcast %cst_5 : f32 to vector<2x64xf32>
    %7 = arith.maximumf %5, %6 : vector<2x64xf32>
    %c0_6 = arith.constant 0 : index
    %c0_7 = arith.constant 0 : index
    %8 = vector.load %arg4[%c0_6, %c0_7] : memref<64x128xf32, #tpu.memory_space<vmem>>, vector<64x128xf32>
    %cst_8 = arith.constant dense<0.000000e+00> : vector<2x128xf32>
    %9 = tpu.matmul %7, %8, %cst_8 {dimension_numbers = #tpu.dot_dimension_numbers<[1], [0], [0], [1], [0, 0, 1, 1], [], []>} : vector<2x64xf32>, vector<64x128xf32>, vector<2x128xf32> -> vector<2x128xf32>
    %c0_9 = arith.constant 0 : index
    %c0_10 = arith.constant 0 : index
    %10 = vector.load %arg5[%c0_9, %c0_10] : memref<1x128xf32, #tpu.memory_space<vmem>>, vector<1x128xf32>
    %11 = vector.broadcast %10 : vector<1x128xf32> to vector<2x128xf32>
    %12 = arith.addf %9, %11 : vector<2x128xf32>
    %c0_11 = arith.constant 0 : index
    %c0_12 = arith.constant 0 : index
    %13 = vector.load %arg8[%c0_11, %c0_12] : memref<2x128xf32, #tpu.memory_space<vmem>>, vector<2x128xf32>
    tpu.vector_store %arg8[%c0_11, %c0_12], %12 {strides = array<i32>} : memref<2x128xf32, #tpu.memory_space<vmem>>, vector<2x128xf32>,
    %c0_13 = arith.constant 0 : index
    %c0_14 = arith.constant 0 : index
    %14 = vector.load %arg1[%c0_13, %c0_14] : memref<2x48xf32, #tpu.memory_space<vmem>>, vector<2x48xf32>
    %c0_15 = arith.constant 0 : index
    %c0_16 = arith.constant 0 : index
    %15 = vector.load %arg6[%c0_15, %c0_16] : memref<48x128xf32, #tpu.memory_space<vmem>>, vector<48x128xf32>
    %cst_17 = arith.constant dense<0.000000e+00> : vector<2x128xf32>
    %16 = tpu.matmul %14, %15, %cst_17 {dimension_numbers = #tpu.dot_dimension_numbers<[1], [0], [0], [1], [0, 0, 1, 1], [], []>} : vector<2x48xf32>, vector<48x128xf32>, vector<2x128xf32> -> vector<2x128xf32>
    %c0_18 = arith.constant 0 : index
    %c0_19 = arith.constant 0 : index
    %17 = vector.load %arg7[%c0_18, %c0_19] : memref<1x128xf32, #tpu.memory_space<vmem>>, vector<1x128xf32>
    %18 = vector.broadcast %17 : vector<1x128xf32> to vector<2x128xf32>
    %19 = arith.addf %16, %18 : vector<2x128xf32>
    %c0_20 = arith.constant 0 : index
    %c0_21 = arith.constant 0 : index
    %20 = vector.load %arg9[%c0_20, %c0_21] : memref<2x128xf32, #tpu.memory_space<vmem>>, vector<2x128xf32>
    tpu.vector_store %arg9[%c0_20, %c0_21], %19 {strides = array<i32>} : memref<2x128xf32, #tpu.memory_space<vmem>>, vector<2x128xf32>,
    return
  }
}

</mosaic_0001>

<bundles_post_ra>
// kernel: tpu_custom_call.1
= control target key start
LH: loop header
LB: loop body
LE: loop exit
PB: predicated region body
PF: predicated region fallthrough
CT: control target
= control target key end

     0   :  { %15 = vsyncpa [#allocation3], 0  ;;  %s730_s0 = inlined_call_operand.hbm [shape: f32[2,32], index: 0, kind: input, shape index: {}]   ;;  %s731_s1 = inlined_call_operand.hbm [shape: f32[2,48], index: 1, kind: input, shape index: {}]   ;;  %s732_s2 = inlined_call_operand.hbm [shape: f32[32,64], index: 2, kind: input, shape index: {}]   ;;  %s733_s3 = inlined_call_operand.vmem [shape: f32[1,64], index: 3, kind: input, shape index: {}]   ;;  %s734_s4 = inlined_call_operand.hbm [shape: f32[64,128], index: 4, kind: input, shape index: {}]   ;;  %s735_s5 = inlined_call_operand.vmem [shape: f32[1,128], index: 5, kind: input, shape index: {}]   ;;  %s736_s6 = inlined_call_operand.hbm [shape: f32[48,128], index: 6, kind: input, shape index: {}]   ;;  %s737_s7 = inlined_call_operand.vmem [shape: f32[1,128], index: 7, kind: input, shape index: {}]   ;;  %s738_s8 = inlined_call_operand.hbm [shape: f32[2,128], index: 8, kind: output, shape index: {0}]   ;;  %s739_s9 = inlined_call_operand.hbm [shape: f32[2,128], index: 9, kind: output, shape index: {1}]  }
   0x1   :  { %16 = vsyncpa [#allocation6], 0 }
   0x2   :  { %17 = vsyncpa [#allocation9], 0 }
   0x3   :  { %18 = vsyncpa [#allocation4], 0 }
   0x4   :  { %19 = vsyncpa [#allocation13], 0  ;;  %s627_s30 = smov [#allocation5]  }
   0x5   :  { %s36_s10 = sshll.u32 %s627_s30, 4  ;;  %s37_s10 = int_to_ptr.vmem [resolvable:$true] %s36_s10 }
   0x6   :  { %s485_s11 = scalar_lea.vmem %s37_s10, 32  ;;  %p490_p1 = scmp.lt.s32.totalorder %s37_s10, %s37_s10 }
   0x7   :  { %p486_p0 = scmp.ne.s32.totalorder %s37_s10, %s485_s11  ;;  %p491_p2 = scmp.lt.s32.totalorder %s485_s11, %s485_s11 }
   0x9   :  { %p492_p3 = por %p491_p2, %p490_p1 }
   0xb   :  { %p493_p4 = pnand %p492_p3, %p486_p0 }
   0xd   :  { %496 = shalt.err (!%p493_p4)
}
   0xe   :  { %39 = dma.hbm_to_vmem [thread:$0]  %s731_s1, 32, %s37_s10, [#allocation6]  }
   0xf   :  { %s628_s14 = smov [#allocation8]   ;;  %s629_s16 = smov [#allocation2]  }
  0x10   :  { %s59_s15 = sshll.u32 %s628_s14, 4  ;;  %s26_s17 = sshll.u32 %s629_s16, 4  ;;  %s60_s15 = int_to_ptr.vmem [resolvable:$true] %s59_s15  ;;  %s27_s17 = int_to_ptr.vmem [resolvable:$true] %s26_s17 }
  0x11   :  { %s505_s18 = scalar_lea.vmem %s60_s15, 1024  ;;  %p510_p6 = scmp.lt.s32.totalorder %s60_s15, %s60_s15 }
  0x12   :  { %p506_p5 = scmp.ne.s32.totalorder %s60_s15, %s505_s18  ;;  %p511_p7 = scmp.lt.s32.totalorder %s505_s18, %s505_s18 }
  0x14   :  { %p512_p8 = por %p511_p7, %p510_p6 }
  0x16   :  { %p513_p9 = pnand %p512_p8, %p506_p5 }
  0x18   :  { %516 = shalt.err (!%p513_p9)
}
  0x19   :  { %s630_s19 = smov 128   ;;  %s631_s20 = smov 8  }
  0x1a   :  { %65 = dma.hbm_to_vmem [thread:$0]  %s734_s4, 1024, %s60_s15, [#allocation9], %s630_s19, %s630_s19, %s631_s20  }
  0x1b   :  { %s525_s1 = scalar_lea.vmem %s27_s17, 32  ;;  %p530_p11 = scmp.lt.s32.totalorder %s27_s17, %s27_s17 }
  0x1c   :  { %p526_p10 = scmp.ne.s32.totalorder %s27_s17, %s525_s1  ;;  %p531_p12 = scmp.lt.s32.totalorder %s525_s1, %s525_s1 }
  0x1e   :  { %p532_p13 = por %p531_p12, %p530_p11 }
  0x20   :  { %p533_p0 = pnand %p532_p13, %p526_p10 }
  0x22   :  { %536 = shalt.err (!%p533_p0)
}
  0x23   :  { %29 = dma.hbm_to_vmem [thread:$0]  %s730_s0, 32, %s27_s17, [#allocation3]  }
  0x24   :  { %s632_s25 = smov [#allocation7]   ;;  %s633_s27 = smov [#allocation10]  }
  0x25   :  { %s45_s26 = sshll.u32 %s632_s25, 4  ;;  %s73_s28 = sshll.u32 %s633_s27, 4  ;;  %s46_s26 = int_to_ptr.vmem [resolvable:$true] %s45_s26  ;;  %s74_s28 = int_to_ptr.vmem [resolvable:$true] %s73_s28 }
  0x26   :  { %s545_s29 = scalar_lea.vmem %s46_s26, 512  ;;  %p550_p2 = scmp.lt.s32.totalorder %s46_s26, %s46_s26 }
  0x27   :  { %p546_p1 = scmp.ne.s32.totalorder %s46_s26, %s545_s29  ;;  %p551_p3 = scmp.lt.s32.totalorder %s545_s29, %s545_s29 }
  0x29   :  { %p552_p4 = por %p551_p3, %p550_p2 }
  0x2b   :  { %p553_p5 = pnand %p552_p4, %p546_p1 }
  0x2d   :  { %556 = shalt.err (!%p553_p5)
}
  0x2e   :  { %51 = dma.hbm_to_vmem [thread:$0]  %s732_s2, 512, %s46_s26, [#allocation6], %s630_s19, %s630_s19, %s631_s20  }
  0x2f   :  { %s565_s0 = scalar_lea.vmem %s74_s28, 768  ;;  %p570_p7 = scmp.lt.s32.totalorder %s74_s28, %s74_s28 }
  0x30   :  { %p566_p6 = scmp.ne.s32.totalorder %s74_s28, %s565_s0  ;;  %p571_p8 = scmp.lt.s32.totalorder %s565_s0, %s565_s0 }
  0x32   :  { %p572_p9 = por %p571_p8, %p570_p7 }
  0x34   :  { %p573_p10 = pnand %p572_p9, %p566_p6 }
  0x36   :  { %576 = shalt.err (!%p573_p10)
}
  0x37   :  { %79 = dma.hbm_to_vmem [thread:$0]  %s736_s6, 768, %s74_s28, [#allocation9], %s630_s19, %s630_s19, %s631_s20  }
  0x38   :  { %617 = dma.done.wait [#allocation3], 32  }
  0x39   :  { %618 = vsyncadd [#allocation3], 4294967264 }
  0x3a   :  { %619 = dma.done.wait [#allocation6], 544  }
  0x3b   :  { %620 = vsyncadd [#allocation6], 4294966752 }
  0x3c   :  { %621 = dma.done.wait [#allocation9], 1792  }
  0x3d   :  { %622 = vsyncadd [#allocation9], 4294965504  ;;  %v634_v0 = vmov 0.0   ;;  %vm635_vm0 = vmmov 0   ;;  %v101_v1 = vld [vmem:[#allocation7 + $0x18] sm:$0xff]  ;;  %v100_v2 = vld [vmem:[#allocation7 + $0x10] sm:$0xff] }
  0x3e   :  { %421 = vmatprep.subr.mxu0 %v634_v0  ;;  %429 = vmatprep.mubr.msk.f32.mxu0 %vm635_vm0, %v634_v0  ;;  %v191_v3 = vld [vmem:[#allocation8 + $0x38] sm:$0xff]  ;;  %v99_v4 = vld [vmem:[#allocation7 + $0x8] sm:$0xff]  ;;  %v190_v5 = vld [vmem:[#allocation8 + $0x30] sm:$0xff]  ;;  %vm109_vm1 = vcmask 261120   ;;  %vm288_vm2 = vcmask 392192   ;;  %vm199_vm3 = vcmask 523264  }
  0x3f   :  { %432 = vmatprep.subr.mxu1 %v634_v0  ;;  %448 = vmatprep.mubr.msk.f32.mxu1 %vm635_vm0, %v634_v0  ;;  %v189_v6 = vld [vmem:[#allocation8 + $0x28] sm:$0xff]  ;;  %v98_v7 = vld [vmem:[#allocation7] sm:$0xff]  ;;  %v97_v8 = vld [vmem:[#allocation2] sm:$0x3]  ;;  %s636_s14 = smov [#allocation12]  }
  0x40   :  { %422 = vmatpush3.msra.mxu0 %v101_v1  ;;  %433 = vmatpush3.msra.mxu1 %v191_v3  ;;  %v280_v9 = vld [vmem:[#allocation10 + $0x28] sm:$0xff]  ;;  %v188_v10 = vld [vmem:[#allocation8 + $0x20] sm:$0xff]  ;;  %v187_v12 = vld [vmem:[#allocation8 + $0x18] sm:$0xff]  ;;  %s379_s15 = sshll.u32 %s636_s14, 4  ;;  %s380_s15 = int_to_ptr.vmem [resolvable:$true] %s379_s15 }
  0x41   :  { %423 = vmatprep.subr.mxu0 %v634_v0  ;;  %434 = vmatprep.subr.mxu1 %v634_v0  ;;  %v279_v11 = vld [vmem:[#allocation10 + $0x20] sm:$0xff]  ;;  %v278_v13 = vld [vmem:[#allocation10 + $0x18] sm:$0xff]  ;;  %v277_v14 = vld [vmem:[#allocation10 + $0x10] sm:$0xff]  ;;  %s577_s16 = scalar_lea.vmem %s380_s15, 32  ;;  %p582_p12 = scmp.lt.s32.totalorder %s380_s15, %s380_s15 }
  0x42   :  { %424 = vmatpush3.msra.mxu0 %v100_v2  ;;  %435 = vmatpush3.msra.mxu1 %v190_v5  ;;  %v186_v15 = vld [vmem:[#allocation8 + $0x10] sm:$0xff]  ;;  %v276_v16 = vld [vmem:[#allocation10 + $0x8] sm:$0xff]  ;;  %v275_v18 = vld [vmem:[#allocation10] sm:$0xff]  ;;  %p578_p11 = scmp.ne.s32.totalorder %s380_s15, %s577_s16  ;;  %p583_p13 = scmp.lt.s32.totalorder %s577_s16, %s577_s16 }
  0x43   :  { %425 = vmatprep.subr.mxu0 %v634_v0  ;;  %436 = vmatprep.subr.mxu1 %v634_v0  ;;  %v185_v17 = vld [vmem:[#allocation8 + $0x8] sm:$0xff]  ;;  %v274_v19 = vld [vmem:[#allocation5] sm:$0x3]  ;;  %v184_v20 = vld [vmem:[#allocation8] sm:$0xff] }
  0x44   :  { %426 = vmatpush3.msra.mxu0 %v99_v4  ;;  %437 = vmatpush3.msra.mxu1 %v189_v6  ;;  %v394_v21 = vld [vmem:[%s733_s3] ss:$0 sm:$0xff]  ;;  %p584_p0 = por %p583_p13, %p582_p12 }
  0x45   :  { %427 = vmatprep.subr.mxu0 %v634_v0  ;;  %438 = vmatprep.subr.mxu1 %v634_v0  ;;  %v398_v26 = vld [vmem:[%s737_s7] ss:$0 sm:$0xff] }
  0x46   :  { %428 = vmatpush3.msra.mxu0 %v98_v7  ;;  %439 = vmatpush3.msra.mxu1 %v188_v10  ;;  %p585_p1 = pnand %p584_p0, %p578_p11 }
  0x47   :  { %430 = vmatmul.mubr.msk.f32.vlgmr.msra.gmra.mxu0 %vm109_vm1, %v97_v8  ;;  %451 = vmatprep.subr.mxu0 %v634_v0 }
  0x48   :  { %452 = vmatpush3.msra.mxu0 %v280_v9  ;;  %440 = vmatprep.subr.mxu1 %v634_v0 }
  0x49   :  { %453 = vmatprep.subr.mxu0 %v634_v0  ;;  %441 = vmatpush3.msra.mxu1 %v187_v12 }
  0x4a   :  { %454 = vmatpush3.msra.mxu0 %v279_v11  ;;  %442 = vmatprep.subr.mxu1 %v634_v0 }
  0x4b   :  { %455 = vmatprep.subr.mxu0 %v634_v0  ;;  %463 = vmatprep.mubr.msk.f32.mxu0 %vm635_vm0, %v634_v0 }
  0x4c   :  { %456 = vmatpush3.msra.mxu0 %v278_v13  ;;  %443 = vmatpush3.msra.mxu1 %v186_v15 }
  0x4d   :  { %457 = vmatprep.subr.mxu0 %v634_v0  ;;  %444 = vmatprep.subr.mxu1 %v634_v0 }
  0x4e   :  { %458 = vmatpush3.msra.mxu0 %v277_v14  ;;  %445 = vmatpush3.msra.mxu1 %v185_v17 }
  0x4f   :  { %459 = vmatprep.subr.mxu0 %v634_v0  ;;  %446 = vmatprep.subr.mxu1 %v634_v0 }
  0x50   :  { %460 = vmatpush3.msra.mxu0 %v276_v16  ;;  %447 = vmatpush3.msra.mxu1 %v184_v20 }
  0x51   :  { %461 = vmatprep.subr.mxu0 %v634_v0 }
  0x52   :  { %462 = vmatpush3.msra.mxu0 %v275_v18 }
  0x53   :  { %464 = vmatmul.mubr.msk.f32.vlgmr.msra.gmra.mxu0 %vm288_vm2, %v274_v19 }
 0x107   :  { %v179_v22 = vpop.f32.mrf.mxu0 }
 0x108   :  { %v180_v23 = vadd.f32 %v394_v21, %v179_v22 }
 0x109   :  { %v431_v24 = vpop.f32.mrf.mxu0 }
 0x10a   :  { %v183_v25 = vmax.f32 %v180_v23, 0.0 }
 0x10c   :  { %449 = vmatmul.mubr.msk.f32.vlgmr.msra.gmra.mxu1 %vm199_vm3, %v183_v25 }
 0x113   :  { %v358_v27 = vpop.f32.mrf.mxu0 }
 0x114   :  { %v359_v28 = vadd.f32 %v398_v26, %v358_v27 }
 0x115   :  { %v465_v29 = vpop.f32.mrf.mxu0 }
 0x116   :  { %362 = vst [vmem:[#allocation12] sm:$0x3] %v359_v28 }
 0x117   :  { %588 = shalt.err (!%p585_p1)
}
 0x118   :  { %382 = dma.vmem_to_hbm [thread:$0]  %s380_s15, 32, %s739_s9, [#allocation13]   ;;  %v396_v30 = vld [vmem:[%s735_s5] ss:$0 sm:$0xff] }
 0x119   :  { %s637_s19 = smov [#allocation11]  }
 0x11a   :  { %s369_s20 = sshll.u32 %s637_s19, 4  ;;  %s370_s20 = int_to_ptr.vmem [resolvable:$true] %s369_s20 }
 0x11b   :  { %s597_s21 = scalar_lea.vmem %s370_s20, 32  ;;  %p602_p3 = scmp.lt.s32.totalorder %s370_s20, %s370_s20 }
 0x11c   :  { %p598_p2 = scmp.ne.s32.totalorder %s370_s20, %s597_s21  ;;  %p603_p4 = scmp.lt.s32.totalorder %s597_s21, %s597_s21 }
 0x11e   :  { %p604_p5 = por %p603_p4, %p602_p3 }
 0x120   :  { %p605_p6 = pnand %p604_p5, %p598_p2 }
 0x1cc   :  { %v269_v31 = vpop.f32.mrf.mxu1 }
 0x1cd   :  { %v270_v32 = vadd.f32 %v396_v30, %v269_v31 }
 0x1ce   :  { %v450_v33 = vpop.f32.mrf.mxu1 }
 0x1cf   :  { %273 = vst [vmem:[#allocation11] sm:$0x3] %v270_v32 }
 0x1d0   :  { %608 = shalt.err (!%p605_p6)
}
 0x1d1   :  { %372 = dma.vmem_to_hbm [thread:$0]  %s370_s20, 32, %s738_s8, [#allocation4]  }
 0x1d2   :  { %623 = dma.done.wait [#allocation4], 32  }
 0x1d3   :  { %624 = vsyncadd [#allocation4], 4294967264 }
 0x1d4   :  { %625 = dma.done.wait [#allocation13], 32  }
 0x1d5   :  { %626 = vsyncadd [#allocation13], 4294967264 }
 0x1d6   :  { %389 = vsyncpa [#allocation3], 1 }
 0x1d7   :  { %390 = vsyncpa [#allocation6], 1 }
 0x1d8   :  { %391 = vsyncpa [#allocation9], 1 }
 0x1d9   :  { %392 = vsyncpa [#allocation4], 1 }
 0x1da   :  { %393 = vsyncpa [#allocation13], 1 }

</bundles_post_ra>
